<compile_context>
chip_gen: v5e
topology: v5e:2x2
jax: 0.10.0
libtpu: 0.0.40
codegen_flags: <defaults>
</compile_context>

<pallas_src>
import math
import functools

import jax
import jax.numpy as jnp
from jax.experimental import pallas as pl
from jax.experimental.pallas import tpu as pltpu


def _round_up(x, m):
    return (x + m - 1) // m * m


# --------------------------- kernels ---------------------------

def _slinear_single_kernel(x_ref, wt_ref, b_ref, o_ref, *, scale):
    # x_ref : (tm, K)   activations (full reduction dim)
    # wt_ref: (K,  tn)  pre-transposed weight tile
    # b_ref : (1,  tn)  bias tile
    # o_ref : (tm, tn)  output tile
    acc = jnp.dot(x_ref[...], wt_ref[...], preferred_element_type=jnp.float32)
    o_ref[...] = (acc * scale + b_ref[...]).astype(o_ref.dtype)


def _slinear_ktiled_kernel(x_ref, wt_ref, b_ref, o_ref, acc_ref, *, scale):
    # K-tiled fallback: f32 accumulator resident across the reduction axis.
    k = pl.program_id(2)

    @pl.when(k == 0)
    def _():
        acc_ref[...] = jnp.zeros_like(acc_ref)

    acc_ref[...] += jnp.dot(
        x_ref[...], wt_ref[...], preferred_element_type=jnp.float32
    )

    @pl.when(k == pl.num_programs(2) - 1)
    def _():
        # Equalized-LR scale + bias fused into the epilogue (f32 VPU math).
        o_ref[...] = (acc_ref[...] * scale + b_ref[...]).astype(o_ref.dtype)


# --------------------------- wrapper ---------------------------

def slinear_forward(x, weight, bias):
    """Equalized-LR linear: x @ (weight * sqrt(2/fan_in)).T + bias.

    x:      (B, dim_in)        float32
    weight: (dim_out, dim_in)  float32 (unscaled *_orig weight)
    bias:   (dim_out,)         float32
    returns (B, dim_out)       float32
    """
    B, K = x.shape
    N, K_w = weight.shape
    assert K == K_w
    scale = math.sqrt(2.0 / K)  # fan_in = dim_in for nn.Linear

    # Pre-transpose weight to (K, N): natural MXU contraction layout.
    wt = weight.T

    # Tile sizes: sublane-aligned on M, lane-dense on N/K.
    tm = min(256, _round_up(B, 8))
    tn = min(512, _round_up(N, 128))
    M_pad = _round_up(B, tm)
    N_pad = _round_up(N, tn)

    K_pad = _round_up(K, 128)
    itemsize = jnp.dtype(x.dtype).itemsize
    # Double-buffered input tiles + bias + output tile, for the single-pass path.
    single_vmem = 2 * (tm * K_pad + K_pad * tn + tn + tm * tn) * itemsize
    use_single = single_vmem <= (8 << 20)

    if use_single:
        tk = K_pad
    else:
        tk = min(1024, K_pad)
        K_pad = _round_up(K, tk)

    x_p = x
    if (M_pad, K_pad) != (B, K):
        x_p = jnp.pad(x, ((0, M_pad - B), (0, K_pad - K)))
    wt_p = wt
    if (K_pad, N_pad) != (K, N):
        wt_p = jnp.pad(wt, ((0, K_pad - K), (0, N_pad - N)))
    b_p = bias if N_pad == N else jnp.pad(bias, (0, N_pad - N))
    b2d = b_p.reshape(1, N_pad)

    if use_single:
        grid = (M_pad // tm, N_pad // tn)
        out = pl.pallas_call(
            functools.partial(_slinear_single_kernel, scale=scale),
            out_shape=jax.ShapeDtypeStruct((M_pad, N_pad), x.dtype),
            grid_spec=pltpu.PrefetchScalarGridSpec(
                num_scalar_prefetch=0,
                grid=grid,
                in_specs=[
                    pl.BlockSpec((tm, tk), lambda i, j: (i, 0)),
                    pl.BlockSpec((tk, tn), lambda i, j: (0, j)),
                    pl.BlockSpec((1, tn), lambda i, j: (0, j)),
                ],
                out_specs=pl.BlockSpec((tm, tn), lambda i, j: (i, j)),
            ),
            compiler_params=pltpu.CompilerParams(
                dimension_semantics=("parallel", "parallel")
            ),
        )(x_p, wt_p, b2d)
    else:
        grid = (M_pad // tm, N_pad // tn, K_pad // tk)
        out = pl.pallas_call(
            functools.partial(_slinear_ktiled_kernel, scale=scale),
            out_shape=jax.ShapeDtypeStruct((M_pad, N_pad), x.dtype),
            grid_spec=pltpu.PrefetchScalarGridSpec(
                num_scalar_prefetch=0,
                grid=grid,
                in_specs=[
                    pl.BlockSpec((tm, tk), lambda i, j, k: (i, k)),
                    pl.BlockSpec((tk, tn), lambda i, j, k: (k, j)),
                    pl.BlockSpec((1, tn), lambda i, j, k: (0, j)),
                ],
                out_specs=pl.BlockSpec((tm, tn), lambda i, j, k: (i, j)),
                scratch_shapes=[pltpu.VMEM((tm, tn), jnp.float32)],
            ),
            compiler_params=pltpu.CompilerParams(
                dimension_semantics=("parallel", "parallel", "arbitrary")
            ),
        )(x_p, wt_p, b2d)

    # Strip padding.
    if (M_pad, N_pad) != (B, N):
        out = out[:B, :N]
    return out


def fc_a_forward(w, weight, bias):
    """FC_A.forward: style vector = SLinear(w), reshaped to (B, 2*C, 1, 1)."""
    style = slinear_forward(w, weight, bias)
    return style[:, :, None, None]


def fc_a_reference(w, weight, bias):
    scale = math.sqrt(2.0 / weight.shape[1])
    y = w @ (weight * scale).T + bias
    return y[:, :, None, None]


if __name__ == "__main__":
    key = jax.random.PRNGKey(0)
    kx, kw = jax.random.split(key)

    B = 4
    dim_latent = 128
    n_channel = 64
    dim_out = n_channel * 2  # 128 (lane-dense)

    # __init__: weight ~ normal_(); bias[:n_channel]=1, bias[n_channel:]=0
    w = jax.random.normal(kx, (B, dim_latent), dtype=jnp.float32)
    weight = jax.random.normal(kw, (dim_out, dim_latent), dtype=jnp.float32)
    bias = jnp.concatenate(
        [jnp.ones((n_channel,), jnp.float32), jnp.zeros((n_channel,), jnp.float32)]
    )

    out = fc_a_forward(w, weight, bias)
    out = jax.block_until_ready(out)

    ref = fc_a_reference(w, weight, bias)
    assert out.shape == (B, dim_out, 1, 1)
    assert jnp.allclose(out, ref, atol=1e-3, rtol=1e-3)

    print("KERNEL_OK")
</pallas_src>

<mosaic_0001>
module attributes {stable_mosaic.version = 11 : i64} {
  func.func @_slinear_single_kernel(%arg0: i32, %arg1: i32, %arg2: memref<8x128xf32, #tpu.memory_space<vmem>>, %arg3: memref<128x128xf32, #tpu.memory_space<vmem>>, %arg4: memref<1x128xf32, #tpu.memory_space<vmem>>, %arg5: memref<8x128xf32, #tpu.memory_space<vmem>>) attributes {dimension_semantics = [#tpu.dimension_semantics<parallel>, #tpu.dimension_semantics<parallel>], iteration_bounds = array<i64: 1, 1>, scalar_prefetch = 0 : i64, scratch_operands = 0 : i64, tpu.core_type = #tpu.core_type<tc>, window_params = [{transform_indices = @transform_0, window_bounds = array<i64: 8, 128>}, {transform_indices = @transform_1, window_bounds = array<i64: 128, 128>}, {transform_indices = @transform_2, window_bounds = array<i64: 1, 128>}, {transform_indices = @transform_3, window_bounds = array<i64: 8, 128>}]} {
    %c0 = arith.constant 0 : index
    %c0_0 = arith.constant 0 : index
    %0 = vector.load %arg2[%c0, %c0_0] : memref<8x128xf32, #tpu.memory_space<vmem>>, vector<8x128xf32>
    %c0_1 = arith.constant 0 : index
    %c0_2 = arith.constant 0 : index
    %1 = vector.load %arg3[%c0_1, %c0_2] : memref<128x128xf32, #tpu.memory_space<vmem>>, vector<128x128xf32>
    %cst = arith.constant dense<0.000000e+00> : vector<8x128xf32>
    %2 = tpu.matmul %0, %1, %cst {dimension_numbers = #tpu.dot_dimension_numbers<[1], [0], [0], [1], [0, 0, 1, 1], [], []>} : vector<8x128xf32>, vector<128x128xf32>, vector<8x128xf32> -> vector<8x128xf32>
    %cst_3 = arith.constant 1.250000e-01 : f32
    %3 = vector.broadcast %cst_3 : f32 to vector<8x128xf32>
    %4 = arith.mulf %2, %3 : vector<8x128xf32>
    %c0_4 = arith.constant 0 : index
    %c0_5 = arith.constant 0 : index
    %5 = vector.load %arg4[%c0_4, %c0_5] : memref<1x128xf32, #tpu.memory_space<vmem>>, vector<1x128xf32>
    %6 = vector.broadcast %5 : vector<1x128xf32> to vector<8x128xf32>
    %7 = arith.addf %4, %6 : vector<8x128xf32>
    %c0_6 = arith.constant 0 : index
    %c0_7 = arith.constant 0 : index
    %8 = vector.load %arg5[%c0_6, %c0_7] : memref<8x128xf32, #tpu.memory_space<vmem>>, vector<8x128xf32>
    tpu.vector_store %arg5[%c0_6, %c0_7], %7 {strides = array<i32>} : memref<8x128xf32, #tpu.memory_space<vmem>>, vector<8x128xf32>,
    return
  }
  func.func @transform_0(%arg0: i32, %arg1: i32) -> (i32, i32) {
    %c0_i32 = arith.constant 0 : i32
    %c0_i32_0 = arith.constant 0 : i32
    return %arg0, %c0_i32 : i32, i32
  }
  func.func @transform_1(%arg0: i32, %arg1: i32) -> (i32, i32) {
    %c0_i32 = arith.constant 0 : i32
    %c0_i32_0 = arith.constant 0 : i32
    return %c0_i32, %arg1 : i32, i32
  }
  func.func @transform_2(%arg0: i32, %arg1: i32) -> (i32, i32) {
    %c0_i32 = arith.constant 0 : i32
    %c0_i32_0 = arith.constant 0 : i32
    return %c0_i32, %arg1 : i32, i32
  }
  func.func @transform_3(%arg0: i32, %arg1: i32) -> (i32, i32) {
    %c0_i32 = arith.constant 0 : i32
    return %arg0, %arg1 : i32, i32
  }
}

</mosaic_0001>

<bundles_post_ra>
// kernel: tpu_custom_call.1
= control target key start
LH: loop header
LB: loop body
LE: loop exit
PB: predicated region body
PF: predicated region fallthrough
CT: control target
= control target key end

     0   :  { %8 = vsyncpa [#allocation3], 0  ;;  %s228_s0 = inlined_call_operand.hbm [shape: f32[8,128], index: 0, kind: input, shape index: {}]   ;;  %s229_s1 = inlined_call_operand.hbm [shape: f32[128,128], index: 1, kind: input, shape index: {}]   ;;  %s230_s2 = inlined_call_operand.vmem [shape: f32[1,128], index: 2, kind: input, shape index: {}]   ;;  %s231_s3 = inlined_call_operand.hbm [shape: f32[8,128], index: 3, kind: output, shape index: {}]  }
   0x1   :  { %9 = vsyncpa [#allocation6], 0 }
   0x2   :  { %10 = vsyncpa [#allocation4], 0  ;;  %s16_s14 = sshll.u32 %s228_s0, 4  ;;  %s191_s15 = smov [#allocation2]   ;;  %s17_s14 = int_to_ptr.hbm [resolvable:$true] %s16_s14 }
   0x3   :  { %s18_s16 = sshll.u32 %s191_s15, 4  ;;  %s26_s19 = sshll.u32 %s229_s1, 4  ;;  %s19_s16 = int_to_ptr.vmem [resolvable:$true] %s18_s16  ;;  %s27_s19 = int_to_ptr.hbm [resolvable:$true] %s26_s19 }
   0x4   :  { %21 = dma.hbm_to_vmem [thread:$0]  %s17_s14, 128, %s19_s16, [#allocation3]  }
   0x5   :  { %s192_s20 = smov [#allocation5]   ;;  %s193_s22 = smov 128  }
   0x6   :  { %s28_s21 = sshll.u32 %s192_s20, 4  ;;  %s194_s23 = smov 8   ;;  %s29_s21 = int_to_ptr.vmem [resolvable:$true] %s28_s21 }
   0x7   :  { %34 = dma.hbm_to_vmem [thread:$0]  %s27_s19, 2048, %s29_s21, [#allocation6], %s193_s22, %s193_s22, %s194_s23  }
   0x8   :  { %185 = dma.done.wait [#allocation3], 128  }
   0x9   :  { %186 = vsyncadd [#allocation3], 4294967168 }
   0xa   :  { %187 = dma.done.wait [#allocation6], 2048  }
   0xb   :  { %188 = vsyncadd [#allocation6], 4294965248  ;;  %v61_v0 = vld [vmem:[#allocation5 + $0x78] sm:$0xff]  ;;  %v60_v1 = vld [vmem:[#allocation5 + $0x70] sm:$0xff]  ;;  %s195_s24 = smov [#allocation7]   ;;  %s96_s28 = sshll.u32 %s231_s3, 4  ;;  %s97_s28 = int_to_ptr.hbm [resolvable:$true] %s96_s28 }
   0xc   :  { %62 = vmatpush.msra.mxu0 %v61_v0  ;;  %v59_v2 = vld [vmem:[#allocation5 + $0x68] sm:$0xff]  ;;  %v58_v3 = vld [vmem:[#allocation5 + $0x60] sm:$0xff]  ;;  %v57_v4 = vld [vmem:[#allocation5 + $0x58] sm:$0xff]  ;;  %s94_s25 = sshll.u32 %s195_s24, 4  ;;  %s95_s25 = int_to_ptr.vmem [resolvable:$true] %s94_s25 }
   0xd   :  { %v56_v5 = vld [vmem:[#allocation5 + $0x50] sm:$0xff]  ;;  %v55_v6 = vld [vmem:[#allocation5 + $0x48] sm:$0xff]  ;;  %v54_v7 = vld [vmem:[#allocation5 + $0x40] sm:$0xff] }
   0xe   :  { %63 = vmatpush.msra.mxu0 %v60_v1  ;;  %v53_v8 = vld [vmem:[#allocation5 + $0x38] sm:$0xff]  ;;  %v52_v9 = vld [vmem:[#allocation5 + $0x30] sm:$0xff]  ;;  %v51_v10 = vld [vmem:[#allocation5 + $0x28] sm:$0xff] }
   0xf   :  { %v50_v11 = vld [vmem:[#allocation5 + $0x20] sm:$0xff]  ;;  %v49_v12 = vld [vmem:[#allocation5 + $0x18] sm:$0xff]  ;;  %v48_v13 = vld [vmem:[#allocation5 + $0x10] sm:$0xff] }
  0x10   :  { %64 = vmatpush.msra.mxu0 %v59_v2  ;;  %v47_v14 = vld [vmem:[#allocation5 + $0x8] sm:$0xff]  ;;  %v46_v15 = vld [vmem:[#allocation5] sm:$0xff]  ;;  %v45_v16 = vld [vmem:[#allocation2] sm:$0xff] }
  0x11   :  { %v112_v17 = vld [vmem:[%s230_s2] ss:$0 sm:$0xff] }
  0x12   :  { %65 = vmatpush.msra.mxu0 %v58_v3 }
  0x14   :  { %66 = vmatpush.msra.mxu0 %v57_v4 }
  0x16   :  { %67 = vmatpush.msra.mxu0 %v56_v5 }
  0x18   :  { %68 = vmatpush.msra.mxu0 %v55_v6 }
  0x1a   :  { %69 = vmatpush.msra.mxu0 %v54_v7 }
  0x1c   :  { %70 = vmatpush.msra.mxu0 %v53_v8 }
  0x1e   :  { %71 = vmatpush.msra.mxu0 %v52_v9 }
  0x20   :  { %72 = vmatpush.msra.mxu0 %v51_v10 }
  0x22   :  { %73 = vmatpush.msra.mxu0 %v50_v11 }
  0x24   :  { %74 = vmatpush.msra.mxu0 %v49_v12 }
  0x26   :  { %75 = vmatpush.msra.mxu0 %v48_v13 }
  0x28   :  { %76 = vmatpush.msra.mxu0 %v47_v14 }
  0x2a   :  { %77 = vmatpush.msra.mxu0 %v46_v15 }
  0x2b   :  { %78 = vmatmul.f32.vlgmr.msra.gmra.mxu0 %v45_v16 }
  0xa8   :  { %v79_v18 = vpop.f32.mrf.mxu0 }
  0xa9   :  { %v82_v19 = vmul.f32 0.125, %v79_v18 }
  0xab   :  { %v87_v20 = vadd.f32 %v112_v17, %v82_v19 }
  0xad   :  { %88 = vst [vmem:[#allocation7] sm:$0xff] %v87_v20 }
  0xae   :  { %99 = dma.vmem_to_hbm [thread:$0]  %s95_s25, 128, %s97_s28, [#allocation4]  }
  0xaf   :  { %189 = dma.done.wait [#allocation4], 128  }
  0xb0   :  { %190 = vsyncadd [#allocation4], 4294967168 }
  0xb1   :  { %104 = vsyncpa [#allocation3], 1 }
  0xb2   :  { %105 = vsyncpa [#allocation6], 1 }
  0xb3   :  { %106 = vsyncpa [#allocation4], 1 }

</bundles_post_ra>
